<compile_context>
chip_gen: v5e
topology: v5e:2x2
jax: 0.10.0
libtpu: 0.0.40
codegen_flags: <defaults>
</compile_context>

<pallas_src>
import math
import functools

import jax
import jax.numpy as jnp
from jax.experimental import pallas as pl
from jax.experimental.pallas import tpu as pltpu


def _token_layer_kernel(
    tok_ref,                     # [R, E]    f32   (R = L * N rows, l-major)
    pos_ref,                     # [R, E_p]  f32
    bias_ref,                    # [R, R]    f32   block-diagonal attention bias
    wqkv_ref, bqkv_ref,          # [D, 3D] bf16, [1, 3D] f32   fused q|k|v proj
    wo_ref, bo_ref,              # [H, Dh, D] bf16, [1, D] f32 out-proj (per head)
    g1_ref, be1_ref,             # [1, D] f32  LayerNorm1
    w1_ref, bf1_ref,             # [D, F] bf16, [1, F] f32
    w2_ref, bf2_ref,             # [F, D] bf16, [1, D] f32
    g2_ref, be2_ref,             # [1, D] f32  LayerNorm2
    o_ref,                       # [R, D] f32
    *, nhead: int, head_dim: int, eps: float = 1e-5,
):
    f32 = jnp.float32
    bf16 = jnp.bfloat16
    D = nhead * head_dim
    R = tok_ref.shape[0]

    # q = k = v = cat(token, pos) -- lane concat in VMEM (no wrapper HBM pass).
    x = jnp.concatenate([tok_ref[...], pos_ref[...]], axis=-1)        # [R, D] f32

    # Fused QKV: one [R, D] x [D, 3D] MXU matmul, bf16 inputs, f32 accumulation.
    qkv = jnp.dot(x.astype(bf16), wqkv_ref[...],
                  preferred_element_type=f32) + bqkv_ref[...]         # [R, 3D] f32

    bias = bias_ref[...]                                              # [R, R] f32
    scale = 1.0 / math.sqrt(head_dim)

    # Per-head attention over ALL R = L*N rows at once; cross-sequence pairs are
    # killed by the block-diagonal bias.  Static loop (nhead=4); head outputs are
    # folded into per-head slices of the output projection -> no concatenate and
    # no head transposes/relayouts.
    attn = jnp.zeros((R, D), f32)
    for h in range(nhead):
        lo = h * head_dim
        qh = qkv[:, lo:lo + head_dim] * scale                          # [R, Dh]
        kh = qkv[:, D + lo:D + lo + head_dim]                          # [R, Dh]
        vh = qkv[:, 2 * D + lo:2 * D + lo + head_dim]                  # [R, Dh]

        s = jnp.einsum("qd,kd->qk", qh.astype(bf16), kh.astype(bf16),
                       preferred_element_type=f32)                     # [R, R]
        s = s + bias
        s = s - jnp.max(s, axis=-1, keepdims=True)
        p = jnp.exp(s)                                                 # f32 softmax
        p = p * pl.reciprocal(jnp.sum(p, axis=-1, keepdims=True), approx=True)

        oh = jnp.dot(p.astype(bf16), vh.astype(bf16),
                     preferred_element_type=f32)                       # [R, Dh]
        # Output projection for this head: oh @ Wo[h*Dh:(h+1)*Dh, :].
        attn = attn + jnp.dot(oh.astype(bf16), wo_ref[h],
                              preferred_element_type=f32)              # [R, D]
    attn = attn + bo_ref[...]

    # residual + LayerNorm1 (dropout1 = identity, eval semantics)
    t = x + attn
    mu = jnp.mean(t, axis=-1, keepdims=True)
    var = jnp.mean((t - mu) ** 2, axis=-1, keepdims=True)
    t = (t - mu) * jax.lax.rsqrt(var + eps) * g1_ref[...] + be1_ref[...]

    # feed-forward: linear1 -> relu -> linear2 (dropout2 = identity)
    ff = jnp.dot(t.astype(bf16), w1_ref[...],
                 preferred_element_type=f32) + bf1_ref[...]            # [R, F]
    ff = jnp.maximum(ff, 0.0)
    ff = jnp.dot(ff.astype(bf16), w2_ref[...],
                 preferred_element_type=f32) + bf2_ref[...]            # [R, D]

    # residual + LayerNorm2 (dropout3 = identity)
    t2 = t + ff
    mu2 = jnp.mean(t2, axis=-1, keepdims=True)
    var2 = jnp.mean((t2 - mu2) ** 2, axis=-1, keepdims=True)
    out = (t2 - mu2) * jax.lax.rsqrt(var2 + eps) * g2_ref[...] + be2_ref[...]

    o_ref[...] = out.astype(o_ref.dtype)


def transformer_token_layer(token, pos, params, *, nhead):
    """token: [L, N, E], pos: [L, N, E_p] (f32). Returns (token_out, pos_out)."""
    L, N, E = token.shape
    E_p = pos.shape[2]
    D = E + E_p
    head_dim = D // nhead
    F = params["w1"].shape[1]
    R = L * N

    # Free row-major reshapes (no transpose, no concat, no extra HBM pass).
    tok2d = token.reshape(R, E)
    pos2d = pos.reshape(R, E_p)

    # Rows are ordered (l * N + b); a query row may only attend to key rows of the
    # same batch element b.  Tiny additive bias built host-side.
    bid = jnp.arange(R, dtype=jnp.int32) % N
    attn_bias = jnp.where(bid[:, None] == bid[None, :], 0.0, -1e9).astype(jnp.float32)

    def full(shape):
        return pl.BlockSpec(shape, lambda i, _s=shape: tuple(0 for _ in _s))

    kernel = functools.partial(_token_layer_kernel, nhead=nhead, head_dim=head_dim)

    out = pl.pallas_call(
        kernel,
        out_shape=jax.ShapeDtypeStruct((R, D), jnp.float32),
        grid=(1,),                      # whole problem in one step (tiny L*N);
                                        # tile the batch here when N is large.
        in_specs=[
            full((R, E)), full((R, E_p)), full((R, R)),
            full((D, 3 * D)), full((1, 3 * D)),
            full((nhead, head_dim, D)), full((1, D)),
            full((1, D)), full((1, D)),
            full((D, F)), full((1, F)),
            full((F, D)), full((1, D)),
            full((1, D)), full((1, D)),
        ],
        out_specs=full((R, D)),
        compiler_params=pltpu.CompilerParams(dimension_semantics=("arbitrary",)),
    )(
        tok2d, pos2d, attn_bias,
        params["wqkv"], params["bqkv"],
        params["wo_heads"], params["bo"],
        params["g1"], params["be1"],
        params["w1"], params["bf1"],
        params["w2"], params["bf2"],
        params["g2"], params["be2"],
    )

    out = out.reshape(L, N, D)          # free reshape back to [L, N, D]
    return out[:, :, :E], out[:, :, E:]


def init_params(key, d_model, nhead, dim_feedforward):
    """Deterministic synthetic parameters (xavier-ish); matmul weights in bf16."""
    D, F = d_model, dim_feedforward
    Dh = D // nhead
    ks = jax.random.split(key, 4)

    def xav(k, shape):
        std = math.sqrt(2.0 / (shape[0] + shape[1]))
        return (std * jax.random.normal(k, shape)).astype(jnp.float32)

    # nn.MultiheadAttention: in_proj_weight [3D, D] -> fused x @ W form [D, 3D]
    # with columns ordered [q | k | v], heads contiguous within each chunk.
    in_proj = xav(ks[0], (3 * D, D))
    wqkv = in_proj.T                               # [D, 3D]
    wo_t = xav(ks[1], (D, D)).T                    # out_proj.weight -> x @ W form

    return dict(
        wqkv=wqkv.astype(jnp.bfloat16),
        bqkv=jnp.zeros((1, 3 * D), jnp.float32),
        wo_heads=wo_t.reshape(nhead, Dh, D).astype(jnp.bfloat16),
        bo=jnp.zeros((1, D), jnp.float32),
        g1=jnp.ones((1, D), jnp.float32), be1=jnp.zeros((1, D), jnp.float32),
        # nn.Linear weight is [out, in]; store transposed so kernel does x @ W.
        w1=xav(ks[2], (F, D)).T.astype(jnp.bfloat16),
        bf1=jnp.zeros((1, F), jnp.float32),
        w2=xav(ks[3], (D, F)).T.astype(jnp.bfloat16),
        bf2=jnp.zeros((1, D), jnp.float32),
        g2=jnp.ones((1, D), jnp.float32), be2=jnp.zeros((1, D), jnp.float32),
    )


# ----------------------------- pure-JAX reference -----------------------------
def _layernorm(x, g, b, eps=1e-5):
    mu = jnp.mean(x, axis=-1, keepdims=True)
    var = jnp.mean((x - mu) ** 2, axis=-1, keepdims=True)
    return (x - mu) * jax.lax.rsqrt(var + eps) * g + b


def reference_token_layer(token, pos, params, *, nhead):
    L, N, E = token.shape
    E_p = pos.shape[2]
    D = E + E_p
    Dh = D // nhead
    f32 = jnp.float32

    x = jnp.concatenate([token, pos], axis=-1)                       # [L, N, D]
    qkv = x @ params["wqkv"].astype(f32) + params["bqkv"][0]         # [L, N, 3D]
    q, k, v = qkv[..., :D], qkv[..., D:2 * D], qkv[..., 2 * D:]
    q = q.reshape(L, N, nhead, Dh) / math.sqrt(Dh)
    k = k.reshape(L, N, nhead, Dh)
    v = v.reshape(L, N, nhead, Dh)
    s = jnp.einsum("lnhd,mnhd->nhlm", q, k)
    p = jax.nn.softmax(s, axis=-1)
    o = jnp.einsum("nhlm,mnhd->lnhd", p, v).reshape(L, N, D)
    wo = params["wo_heads"].astype(f32).reshape(D, D)
    t = x + o @ wo + params["bo"][0]
    t = _layernorm(t, params["g1"][0], params["be1"][0])
    ff = jnp.maximum(t @ params["w1"].astype(f32) + params["bf1"][0], 0.0)
    ff = ff @ params["w2"].astype(f32) + params["bf2"][0]
    t = _layernorm(t + ff, params["g2"][0], params["be2"][0])
    return t[..., :E], t[..., E:]


if __name__ == "__main__":
    # Small shapes consistent with the module: token [L, N, E], pos [L, N, E_p],
    # d_model = E + E_p.
    L, N, E, E_p = 8, 2, 24, 8
    d_model = E + E_p          # 32
    nhead = 4
    dim_feedforward = 64

    key = jax.random.PRNGKey(0)
    k_tok, k_pos, k_par = jax.random.split(key, 3)
    token = jax.random.normal(k_tok, (L, N, E), dtype=jnp.float32)
    pos = jax.random.normal(k_pos, (L, N, E_p), dtype=jnp.float32)
    params = init_params(k_par, d_model, nhead, dim_feedforward)

    token_out, pos_out = transformer_token_layer(token, pos, params, nhead=nhead)
    jax.block_until_ready((token_out, pos_out))

    ref_tok, ref_pos = reference_token_layer(token, pos, params, nhead=nhead)
    err = max(float(jnp.max(jnp.abs(token_out - ref_tok))),
              float(jnp.max(jnp.abs(pos_out - ref_pos))))

    assert token_out.shape == (L, N, E)
    assert pos_out.shape == (L, N, E_p)
    assert bool(jnp.all(jnp.isfinite(token_out))) and bool(jnp.all(jnp.isfinite(pos_out)))
    # Loose tolerance: bf16 MXU inputs + approx reciprocal vs. pure-f32 reference.
    assert err < 0.15, f"kernel deviates from f32 reference: max_abs_err={err}"
    print("KERNEL_OK")
</pallas_src>

<mosaic_0001>
module attributes {stable_mosaic.version = 11 : i64} {
  func.func @_token_layer_kernel(%arg0: i32, %arg1: memref<16x24xf32, #tpu.memory_space<vmem>>, %arg2: memref<16x8xf32, #tpu.memory_space<vmem>>, %arg3: memref<16x16xf32, #tpu.memory_space<vmem>>, %arg4: memref<32x96xbf16, #tpu.memory_space<vmem>>, %arg5: memref<1x96xf32, #tpu.memory_space<vmem>>, %arg6: memref<4x8x32xbf16, #tpu.memory_space<vmem>>, %arg7: memref<1x32xf32, #tpu.memory_space<vmem>>, %arg8: memref<1x32xf32, #tpu.memory_space<vmem>>, %arg9: memref<1x32xf32, #tpu.memory_space<vmem>>, %arg10: memref<32x64xbf16, #tpu.memory_space<vmem>>, %arg11: memref<1x64xf32, #tpu.memory_space<vmem>>, %arg12: memref<64x32xbf16, #tpu.memory_space<vmem>>, %arg13: memref<1x32xf32, #tpu.memory_space<vmem>>, %arg14: memref<1x32xf32, #tpu.memory_space<vmem>>, %arg15: memref<1x32xf32, #tpu.memory_space<vmem>>, %arg16: memref<16x32xf32, #tpu.memory_space<vmem>>) attributes {dimension_semantics = [#tpu.dimension_semantics<arbitrary>], iteration_bounds = array<i64: 1>, scalar_prefetch = 0 : i64, scratch_operands = 0 : i64, tpu.core_type = #tpu.core_type<tc>, window_params = [{pipeline_mode = #tpu.pipeline_mode<synchronous>, transform_indices = @transform_0, window_bounds = array<i64: 16, 24>}, {pipeline_mode = #tpu.pipeline_mode<synchronous>, transform_indices = @transform_1, window_bounds = array<i64: 16, 8>}, {pipeline_mode = #tpu.pipeline_mode<synchronous>, transform_indices = @transform_2, window_bounds = array<i64: 16, 16>}, {pipeline_mode = #tpu.pipeline_mode<synchronous>, transform_indices = @transform_3, window_bounds = array<i64: 32, 96>}, {pipeline_mode = #tpu.pipeline_mode<synchronous>, transform_indices = @transform_4, window_bounds = array<i64: 1, 96>}, {pipeline_mode = #tpu.pipeline_mode<synchronous>, transform_indices = @transform_5, window_bounds = array<i64: 4, 8, 32>}, {pipeline_mode = #tpu.pipeline_mode<synchronous>, transform_indices = @transform_6, window_bounds = array<i64: 1, 32>}, {pipeline_mode = #tpu.pipeline_mode<synchronous>, transform_indices = @transform_7, window_bounds = array<i64: 1, 32>}, {pipeline_mode = #tpu.pipeline_mode<synchronous>, transform_indices = @transform_8, window_bounds = array<i64: 1, 32>}, {pipeline_mode = #tpu.pipeline_mode<synchronous>, transform_indices = @transform_9, window_bounds = array<i64: 32, 64>}, {pipeline_mode = #tpu.pipeline_mode<synchronous>, transform_indices = @transform_10, window_bounds = array<i64: 1, 64>}, {pipeline_mode = #tpu.pipeline_mode<synchronous>, transform_indices = @transform_11, window_bounds = array<i64: 64, 32>}, {pipeline_mode = #tpu.pipeline_mode<synchronous>, transform_indices = @transform_12, window_bounds = array<i64: 1, 32>}, {pipeline_mode = #tpu.pipeline_mode<synchronous>, transform_indices = @transform_13, window_bounds = array<i64: 1, 32>}, {pipeline_mode = #tpu.pipeline_mode<synchronous>, transform_indices = @transform_14, window_bounds = array<i64: 1, 32>}, {pipeline_mode = #tpu.pipeline_mode<synchronous>, transform_indices = @transform_15, window_bounds = array<i64: 16, 32>}]} {
    %c0 = arith.constant 0 : index
    %c0_0 = arith.constant 0 : index
    %0 = vector.load %arg1[%c0, %c0_0] : memref<16x24xf32, #tpu.memory_space<vmem>>, vector<16x24xf32>
    %c0_1 = arith.constant 0 : index
    %c0_2 = arith.constant 0 : index
    %1 = vector.load %arg2[%c0_1, %c0_2] : memref<16x8xf32, #tpu.memory_space<vmem>>, vector<16x8xf32>
    %2 = tpu.concatenate %0, %1 in 1 : vector<16x24xf32>, vector<16x8xf32> -> vector<16x32xf32>
    %3 = arith.truncf %2 : vector<16x32xf32> to vector<16x32xbf16>
    %c0_3 = arith.constant 0 : index
    %c0_4 = arith.constant 0 : index
    %4 = vector.load %arg4[%c0_3, %c0_4] : memref<32x96xbf16, #tpu.memory_space<vmem>>, vector<32x96xbf16>
    %cst = arith.constant dense<0.000000e+00> : vector<16x96xf32>
    %5 = tpu.matmul %3, %4, %cst {dimension_numbers = #tpu.dot_dimension_numbers<[1], [0], [0], [1], [0, 0, 1, 1], [], []>} : vector<16x32xbf16>, vector<32x96xbf16>, vector<16x96xf32> -> vector<16x96xf32>
    %c0_5 = arith.constant 0 : index
    %c0_6 = arith.constant 0 : index
    %6 = vector.load %arg5[%c0_5, %c0_6] : memref<1x96xf32, #tpu.memory_space<vmem>>, vector<1x96xf32>
    %7 = vector.broadcast %6 : vector<1x96xf32> to vector<16x96xf32>
    %8 = arith.addf %5, %7 : vector<16x96xf32>
    %c0_7 = arith.constant 0 : index
    %c0_8 = arith.constant 0 : index
    %9 = vector.load %arg3[%c0_7, %c0_8] : memref<16x16xf32, #tpu.memory_space<vmem>>, vector<16x16xf32>
    %cst_9 = arith.constant 0.000000e+00 : f32
    %10 = vector.broadcast %cst_9 : f32 to vector<16x32xf32>
    %11 = vector.extract_strided_slice %8 {offsets = [0, 0], sizes = [16, 8], strides = [1, 1]} : vector<16x96xf32> to vector<16x8xf32>
    %cst_10 = arith.constant 0.353553385 : f32
    %12 = vector.broadcast %cst_10 : f32 to vector<16x8xf32>
    %13 = arith.mulf %11, %12 : vector<16x8xf32>
    %14 = vector.extract_strided_slice %8 {offsets = [0, 32], sizes = [16, 8], strides = [1, 1]} : vector<16x96xf32> to vector<16x8xf32>
    %15 = vector.extract_strided_slice %8 {offsets = [0, 64], sizes = [16, 8], strides = [1, 1]} : vector<16x96xf32> to vector<16x8xf32>
    %16 = arith.truncf %13 : vector<16x8xf32> to vector<16x8xbf16>
    %17 = arith.truncf %14 : vector<16x8xf32> to vector<16x8xbf16>
    "tpu.trace_start"() <{level = 10 : i32, message = "qd,kd->qk"}> : () -> ()
    %cst_11 = arith.constant dense<0.000000e+00> : vector<16x16xf32>
    %18 = tpu.matmul %16, %17, %cst_11 {dimension_numbers = #tpu.dot_dimension_numbers<[1], [1], [0], [0], [0, 0, 1, 0], [], []>} : vector<16x8xbf16>, vector<16x8xbf16>, vector<16x16xf32> -> vector<16x16xf32>
    "tpu.trace_stop"() : () -> ()
    %19 = arith.addf %18, %9 : vector<16x16xf32>
    %cst_12 = arith.constant dense<0xFF800000> : vector<16xf32>
    %20 = vector.multi_reduction <maximumf>, %19, %cst_12 [1] : vector<16x16xf32> to vector<16xf32>
    %21 = vector.shape_cast %20 : vector<16xf32> to vector<16x1xf32>
    %22 = vector.broadcast %21 : vector<16x1xf32> to vector<16x16xf32>
    %23 = arith.subf %19, %22 : vector<16x16xf32>
    %24 = math.exp %23 : vector<16x16xf32>
    %cst_13 = arith.constant dense<0.000000e+00> : vector<16xf32>
    %25 = vector.multi_reduction <add>, %24, %cst_13 [1] : vector<16x16xf32> to vector<16xf32>
    %26 = vector.shape_cast %25 : vector<16xf32> to vector<16x1xf32>
    %27 = tpu.reciprocal %26 {approx = true} : vector<16x1xf32> -> vector<16x1xf32>
    %28 = vector.broadcast %27 : vector<16x1xf32> to vector<16x16xf32>
    %29 = arith.mulf %24, %28 : vector<16x16xf32>
    %30 = arith.truncf %29 : vector<16x16xf32> to vector<16x16xbf16>
    %31 = arith.truncf %15 : vector<16x8xf32> to vector<16x8xbf16>
    %cst_14 = arith.constant dense<0.000000e+00> : vector<16x8xf32>
    %32 = tpu.matmul %30, %31, %cst_14 {dimension_numbers = #tpu.dot_dimension_numbers<[1], [0], [0], [1], [0, 0, 1, 1], [], []>} : vector<16x16xbf16>, vector<16x8xbf16>, vector<16x8xf32> -> vector<16x8xf32>
    %33 = arith.truncf %32 : vector<16x8xf32> to vector<16x8xbf16>
    %c0_15 = arith.constant 0 : index
    %c0_16 = arith.constant 0 : index
    %c0_17 = arith.constant 0 : index
    %34 = vector.load %arg6[%c0_15, %c0_16, %c0_17] : memref<4x8x32xbf16, #tpu.memory_space<vmem>>, vector<1x8x32xbf16>
    %35 = vector.shape_cast %34 : vector<1x8x32xbf16> to vector<8x32xbf16>
    %cst_18 = arith.constant dense<0.000000e+00> : vector<16x32xf32>
    %36 = tpu.matmul %33, %35, %cst_18 {dimension_numbers = #tpu.dot_dimension_numbers<[1], [0], [0], [1], [0, 0, 1, 1], [], []>} : vector<16x8xbf16>, vector<8x32xbf16>, vector<16x32xf32> -> vector<16x32xf32>
    %37 = arith.addf %10, %36 : vector<16x32xf32>
    %38 = vector.extract_strided_slice %8 {offsets = [0, 8], sizes = [16, 8], strides = [1, 1]} : vector<16x96xf32> to vector<16x8xf32>
    %cst_19 = arith.constant 0.353553385 : f32
    %39 = vector.broadcast %cst_19 : f32 to vector<16x8xf32>
    %40 = arith.mulf %38, %39 : vector<16x8xf32>
    %41 = vector.extract_strided_slice %8 {offsets = [0, 40], sizes = [16, 8], strides = [1, 1]} : vector<16x96xf32> to vector<16x8xf32>
    %42 = vector.extract_strided_slice %8 {offsets = [0, 72], sizes = [16, 8], strides = [1, 1]} : vector<16x96xf32> to vector<16x8xf32>
    %43 = arith.truncf %40 : vector<16x8xf32> to vector<16x8xbf16>
    %44 = arith.truncf %41 : vector<16x8xf32> to vector<16x8xbf16>
    "tpu.trace_start"() <{level = 10 : i32, message = "qd,kd->qk"}> : () -> ()
    %cst_20 = arith.constant dense<0.000000e+00> : vector<16x16xf32>
    %45 = tpu.matmul %43, %44, %cst_20 {dimension_numbers = #tpu.dot_dimension_numbers<[1], [1], [0], [0], [0, 0, 1, 0], [], []>} : vector<16x8xbf16>, vector<16x8xbf16>, vector<16x16xf32> -> vector<16x16xf32>
    "tpu.trace_stop"() : () -> ()
    %46 = arith.addf %45, %9 : vector<16x16xf32>
    %cst_21 = arith.constant dense<0xFF800000> : vector<16xf32>
    %47 = vector.multi_reduction <maximumf>, %46, %cst_21 [1] : vector<16x16xf32> to vector<16xf32>
    %48 = vector.shape_cast %47 : vector<16xf32> to vector<16x1xf32>
    %49 = vector.broadcast %48 : vector<16x1xf32> to vector<16x16xf32>
    %50 = arith.subf %46, %49 : vector<16x16xf32>
    %51 = math.exp %50 : vector<16x16xf32>
    %cst_22 = arith.constant dense<0.000000e+00> : vector<16xf32>
    %52 = vector.multi_reduction <add>, %51, %cst_22 [1] : vector<16x16xf32> to vector<16xf32>
    %53 = vector.shape_cast %52 : vector<16xf32> to vector<16x1xf32>
    %54 = tpu.reciprocal %53 {approx = true} : vector<16x1xf32> -> vector<16x1xf32>
    %55 = vector.broadcast %54 : vector<16x1xf32> to vector<16x16xf32>
    %56 = arith.mulf %51, %55 : vector<16x16xf32>
    %57 = arith.truncf %56 : vector<16x16xf32> to vector<16x16xbf16>
    %58 = arith.truncf %42 : vector<16x8xf32> to vector<16x8xbf16>
    %cst_23 = arith.constant dense<0.000000e+00> : vector<16x8xf32>
    %59 = tpu.matmul %57, %58, %cst_23 {dimension_numbers = #tpu.dot_dimension_numbers<[1], [0], [0], [1], [0, 0, 1, 1], [], []>} : vector<16x16xbf16>, vector<16x8xbf16>, vector<16x8xf32> -> vector<16x8xf32>
    %60 = arith.truncf %59 : vector<16x8xf32> to vector<16x8xbf16>
    %c1 = arith.constant 1 : index
    %c0_24 = arith.constant 0 : index
    %c0_25 = arith.constant 0 : index
    %61 = vector.load %arg6[%c1, %c0_24, %c0_25] : memref<4x8x32xbf16, #tpu.memory_space<vmem>>, vector<1x8x32xbf16>
    %62 = vector.shape_cast %61 : vector<1x8x32xbf16> to vector<8x32xbf16>
    %cst_26 = arith.constant dense<0.000000e+00> : vector<16x32xf32>
    %63 = tpu.matmul %60, %62, %cst_26 {dimension_numbers = #tpu.dot_dimension_numbers<[1], [0], [0], [1], [0, 0, 1, 1], [], []>} : vector<16x8xbf16>, vector<8x32xbf16>, vector<16x32xf32> -> vector<16x32xf32>
    %64 = arith.addf %37, %63 : vector<16x32xf32>
    %65 = vector.extract_strided_slice %8 {offsets = [0, 16], sizes = [16, 8], strides = [1, 1]} : vector<16x96xf32> to vector<16x8xf32>
    %cst_27 = arith.constant 0.353553385 : f32
    %66 = vector.broadcast %cst_27 : f32 to vector<16x8xf32>
    %67 = arith.mulf %65, %66 : vector<16x8xf32>
    %68 = vector.extract_strided_slice %8 {offsets = [0, 48], sizes = [16, 8], strides = [1, 1]} : vector<16x96xf32> to vector<16x8xf32>
    %69 = vector.extract_strided_slice %8 {offsets = [0, 80], sizes = [16, 8], strides = [1, 1]} : vector<16x96xf32> to vector<16x8xf32>
    %70 = arith.truncf %67 : vector<16x8xf32> to vector<16x8xbf16>
    %71 = arith.truncf %68 : vector<16x8xf32> to vector<16x8xbf16>
    "tpu.trace_start"() <{level = 10 : i32, message = "qd,kd->qk"}> : () -> ()
    %cst_28 = arith.constant dense<0.000000e+00> : vector<16x16xf32>
    %72 = tpu.matmul %70, %71, %cst_28 {dimension_numbers = #tpu.dot_dimension_numbers<[1], [1], [0], [0], [0, 0, 1, 0], [], []>} : vector<16x8xbf16>, vector<16x8xbf16>, vector<16x16xf32> -> vector<16x16xf32>
    "tpu.trace_stop"() : () -> ()
    %73 = arith.addf %72, %9 : vector<16x16xf32>
    %cst_29 = arith.constant dense<0xFF800000> : vector<16xf32>
    %74 = vector.multi_reduction <maximumf>, %73, %cst_29 [1] : vector<16x16xf32> to vector<16xf32>
    %75 = vector.shape_cast %74 : vector<16xf32> to vector<16x1xf32>
    %76 = vector.broadcast %75 : vector<16x1xf32> to vector<16x16xf32>
    %77 = arith.subf %73, %76 : vector<16x16xf32>
    %78 = math.exp %77 : vector<16x16xf32>
    %cst_30 = arith.constant dense<0.000000e+00> : vector<16xf32>
    %79 = vector.multi_reduction <add>, %78, %cst_30 [1] : vector<16x16xf32> to vector<16xf32>
    %80 = vector.shape_cast %79 : vector<16xf32> to vector<16x1xf32>
    %81 = tpu.reciprocal %80 {approx = true} : vector<16x1xf32> -> vector<16x1xf32>
    %82 = vector.broadcast %81 : vector<16x1xf32> to vector<16x16xf32>
    %83 = arith.mulf %78, %82 : vector<16x16xf32>
    %84 = arith.truncf %83 : vector<16x16xf32> to vector<16x16xbf16>
    %85 = arith.truncf %69 : vector<16x8xf32> to vector<16x8xbf16>
    %cst_31 = arith.constant dense<0.000000e+00> : vector<16x8xf32>
    %86 = tpu.matmul %84, %85, %cst_31 {dimension_numbers = #tpu.dot_dimension_numbers<[1], [0], [0], [1], [0, 0, 1, 1], [], []>} : vector<16x16xbf16>, vector<16x8xbf16>, vector<16x8xf32> -> vector<16x8xf32>
    %87 = arith.truncf %86 : vector<16x8xf32> to vector<16x8xbf16>
    %c2 = arith.constant 2 : index
    %c0_32 = arith.constant 0 : index
    %c0_33 = arith.constant 0 : index
    %88 = vector.load %arg6[%c2, %c0_32, %c0_33] : memref<4x8x32xbf16, #tpu.memory_space<vmem>>, vector<1x8x32xbf16>
    %89 = vector.shape_cast %88 : vector<1x8x32xbf16> to vector<8x32xbf16>
    %cst_34 = arith.constant dense<0.000000e+00> : vector<16x32xf32>
    %90 = tpu.matmul %87, %89, %cst_34 {dimension_numbers = #tpu.dot_dimension_numbers<[1], [0], [0], [1], [0, 0, 1, 1], [], []>} : vector<16x8xbf16>, vector<8x32xbf16>, vector<16x32xf32> -> vector<16x32xf32>
    %91 = arith.addf %64, %90 : vector<16x32xf32>
    %92 = vector.extract_strided_slice %8 {offsets = [0, 24], sizes = [16, 8], strides = [1, 1]} : vector<16x96xf32> to vector<16x8xf32>
    %cst_35 = arith.constant 0.353553385 : f32
    %93 = vector.broadcast %cst_35 : f32 to vector<16x8xf32>
    %94 = arith.mulf %92, %93 : vector<16x8xf32>
    %95 = vector.extract_strided_slice %8 {offsets = [0, 56], sizes = [16, 8], strides = [1, 1]} : vector<16x96xf32> to vector<16x8xf32>
    %96 = vector.extract_strided_slice %8 {offsets = [0, 88], sizes = [16, 8], strides = [1, 1]} : vector<16x96xf32> to vector<16x8xf32>
    %97 = arith.truncf %94 : vector<16x8xf32> to vector<16x8xbf16>
    %98 = arith.truncf %95 : vector<16x8xf32> to vector<16x8xbf16>
    "tpu.trace_start"() <{level = 10 : i32, message = "qd,kd->qk"}> : () -> ()
    %cst_36 = arith.constant dense<0.000000e+00> : vector<16x16xf32>
    %99 = tpu.matmul %97, %98, %cst_36 {dimension_numbers = #tpu.dot_dimension_numbers<[1], [1], [0], [0], [0, 0, 1, 0], [], []>} : vector<16x8xbf16>, vector<16x8xbf16>, vector<16x16xf32> -> vector<16x16xf32>
    "tpu.trace_stop"() : () -> ()
    %100 = arith.addf %99, %9 : vector<16x16xf32>
    %cst_37 = arith.constant dense<0xFF800000> : vector<16xf32>
    %101 = vector.multi_reduction <maximumf>, %100, %cst_37 [1] : vector<16x16xf32> to vector<16xf32>
    %102 = vector.shape_cast %101 : vector<16xf32> to vector<16x1xf32>
    %103 = vector.broadcast %102 : vector<16x1xf32> to vector<16x16xf32>
    %104 = arith.subf %100, %103 : vector<16x16xf32>
    %105 = math.exp %104 : vector<16x16xf32>
    %cst_38 = arith.constant dense<0.000000e+00> : vector<16xf32>
    %106 = vector.multi_reduction <add>, %105, %cst_38 [1] : vector<16x16xf32> to vector<16xf32>
    %107 = vector.shape_cast %106 : vector<16xf32> to vector<16x1xf32>
    %108 = tpu.reciprocal %107 {approx = true} : vector<16x1xf32> -> vector<16x1xf32>
    %109 = vector.broadcast %108 : vector<16x1xf32> to vector<16x16xf32>
    %110 = arith.mulf %105, %109 : vector<16x16xf32>
    %111 = arith.truncf %110 : vector<16x16xf32> to vector<16x16xbf16>
    %112 = arith.truncf %96 : vector<16x8xf32> to vector<16x8xbf16>
    %cst_39 = arith.constant dense<0.000000e+00> : vector<16x8xf32>
    %113 = tpu.matmul %111, %112, %cst_39 {dimension_numbers = #tpu.dot_dimension_numbers<[1], [0], [0], [1], [0, 0, 1, 1], [], []>} : vector<16x16xbf16>, vector<16x8xbf16>, vector<16x8xf32> -> vector<16x8xf32>
    %114 = arith.truncf %113 : vector<16x8xf32> to vector<16x8xbf16>
    %c3 = arith.constant 3 : index
    %c0_40 = arith.constant 0 : index
    %c0_41 = arith.constant 0 : index
    %115 = vector.load %arg6[%c3, %c0_40, %c0_41] : memref<4x8x32xbf16, #tpu.memory_space<vmem>>, vector<1x8x32xbf16>
    %116 = vector.shape_cast %115 : vector<1x8x32xbf16> to vector<8x32xbf16>
    %cst_42 = arith.constant dense<0.000000e+00> : vector<16x32xf32>
    %117 = tpu.matmul %114, %116, %cst_42 {dimension_numbers = #tpu.dot_dimension_numbers<[1], [0], [0], [1], [0, 0, 1, 1], [], []>} : vector<16x8xbf16>, vector<8x32xbf16>, vector<16x32xf32> -> vector<16x32xf32>
    %118 = arith.addf %91, %117 : vector<16x32xf32>
    %c0_43 = arith.constant 0 : index
    %c0_44 = arith.constant 0 : index
    %119 = vector.load %arg7[%c0_43, %c0_44] : memref<1x32xf32, #tpu.memory_space<vmem>>, vector<1x32xf32>
    %120 = vector.broadcast %119 : vector<1x32xf32> to vector<16x32xf32>
    %121 = arith.addf %118, %120 : vector<16x32xf32>
    %122 = arith.addf %2, %121 : vector<16x32xf32>
    %cst_45 = arith.constant dense<0.000000e+00> : vector<16xf32>
    %123 = vector.multi_reduction <add>, %122, %cst_45 [1] : vector<16x32xf32> to vector<16xf32>
    %124 = vector.shape_cast %123 : vector<16xf32> to vector<16x1xf32>
    %cst_46 = arith.constant 3.200000e+01 : f32
    %125 = vector.broadcast %cst_46 : f32 to vector<16x1xf32>
    %126 = arith.divf %124, %125 : vector<16x1xf32>
    %127 = vector.broadcast %126 : vector<16x1xf32> to vector<16x32xf32>
    %128 = arith.subf %122, %127 : vector<16x32xf32>
    %129 = arith.mulf %128, %128 : vector<16x32xf32>
    %cst_47 = arith.constant dense<0.000000e+00> : vector<16xf32>
    %130 = vector.multi_reduction <add>, %129, %cst_47 [1] : vector<16x32xf32> to vector<16xf32>
    %131 = vector.shape_cast %130 : vector<16xf32> to vector<16x1xf32>
    %cst_48 = arith.constant 3.200000e+01 : f32
    %132 = vector.broadcast %cst_48 : f32 to vector<16x1xf32>
    %133 = arith.divf %131, %132 : vector<16x1xf32>
    %134 = vector.broadcast %126 : vector<16x1xf32> to vector<16x32xf32>
    %135 = arith.subf %122, %134 : vector<16x32xf32>
    %cst_49 = arith.constant 9.99999974E-6 : f32
    %136 = vector.broadcast %cst_49 : f32 to vector<16x1xf32>
    %137 = arith.addf %133, %136 : vector<16x1xf32>
    %138 = math.rsqrt %137 : vector<16x1xf32>
    %139 = vector.broadcast %138 : vector<16x1xf32> to vector<16x32xf32>
    %140 = arith.mulf %135, %139 : vector<16x32xf32>
    %c0_50 = arith.constant 0 : index
    %c0_51 = arith.constant 0 : index
    %141 = vector.load %arg8[%c0_50, %c0_51] : memref<1x32xf32, #tpu.memory_space<vmem>>, vector<1x32xf32>
    %142 = vector.broadcast %141 : vector<1x32xf32> to vector<16x32xf32>
    %143 = arith.mulf %140, %142 : vector<16x32xf32>
    %c0_52 = arith.constant 0 : index
    %c0_53 = arith.constant 0 : index
    %144 = vector.load %arg9[%c0_52, %c0_53] : memref<1x32xf32, #tpu.memory_space<vmem>>, vector<1x32xf32>
    %145 = vector.broadcast %144 : vector<1x32xf32> to vector<16x32xf32>
    %146 = arith.addf %143, %145 : vector<16x32xf32>
    %147 = arith.truncf %146 : vector<16x32xf32> to vector<16x32xbf16>
    %c0_54 = arith.constant 0 : index
    %c0_55 = arith.constant 0 : index
    %148 = vector.load %arg10[%c0_54, %c0_55] : memref<32x64xbf16, #tpu.memory_space<vmem>>, vector<32x64xbf16>
    %cst_56 = arith.constant dense<0.000000e+00> : vector<16x64xf32>
    %149 = tpu.matmul %147, %148, %cst_56 {dimension_numbers = #tpu.dot_dimension_numbers<[1], [0], [0], [1], [0, 0, 1, 1], [], []>} : vector<16x32xbf16>, vector<32x64xbf16>, vector<16x64xf32> -> vector<16x64xf32>
    %c0_57 = arith.constant 0 : index
    %c0_58 = arith.constant 0 : index
    %150 = vector.load %arg11[%c0_57, %c0_58] : memref<1x64xf32, #tpu.memory_space<vmem>>, vector<1x64xf32>
    %151 = vector.broadcast %150 : vector<1x64xf32> to vector<16x64xf32>
    %152 = arith.addf %149, %151 : vector<16x64xf32>
    %cst_59 = arith.constant 0.000000e+00 : f32
    %153 = vector.broadcast %cst_59 : f32 to vector<16x64xf32>
    %154 = arith.maximumf %152, %153 : vector<16x64xf32>
    %155 = arith.truncf %154 : vector<16x64xf32> to vector<16x64xbf16>
    %c0_60 = arith.constant 0 : index
    %c0_61 = arith.constant 0 : index
    %156 = vector.load %arg12[%c0_60, %c0_61] : memref<64x32xbf16, #tpu.memory_space<vmem>>, vector<64x32xbf16>
    %cst_62 = arith.constant dense<0.000000e+00> : vector<16x32xf32>
    %157 = tpu.matmul %155, %156, %cst_62 {dimension_numbers = #tpu.dot_dimension_numbers<[1], [0], [0], [1], [0, 0, 1, 1], [], []>} : vector<16x64xbf16>, vector<64x32xbf16>, vector<16x32xf32> -> vector<16x32xf32>
    %c0_63 = arith.constant 0 : index
    %c0_64 = arith.constant 0 : index
    %158 = vector.load %arg13[%c0_63, %c0_64] : memref<1x32xf32, #tpu.memory_space<vmem>>, vector<1x32xf32>
    %159 = vector.broadcast %158 : vector<1x32xf32> to vector<16x32xf32>
    %160 = arith.addf %157, %159 : vector<16x32xf32>
    %161 = arith.addf %146, %160 : vector<16x32xf32>
    %cst_65 = arith.constant dense<0.000000e+00> : vector<16xf32>
    %162 = vector.multi_reduction <add>, %161, %cst_65 [1] : vector<16x32xf32> to vector<16xf32>
    %163 = vector.shape_cast %162 : vector<16xf32> to vector<16x1xf32>
    %cst_66 = arith.constant 3.200000e+01 : f32
    %164 = vector.broadcast %cst_66 : f32 to vector<16x1xf32>
    %165 = arith.divf %163, %164 : vector<16x1xf32>
    %166 = vector.broadcast %165 : vector<16x1xf32> to vector<16x32xf32>
    %167 = arith.subf %161, %166 : vector<16x32xf32>
    %168 = arith.mulf %167, %167 : vector<16x32xf32>
    %cst_67 = arith.constant dense<0.000000e+00> : vector<16xf32>
    %169 = vector.multi_reduction <add>, %168, %cst_67 [1] : vector<16x32xf32> to vector<16xf32>
    %170 = vector.shape_cast %169 : vector<16xf32> to vector<16x1xf32>
    %cst_68 = arith.constant 3.200000e+01 : f32
    %171 = vector.broadcast %cst_68 : f32 to vector<16x1xf32>
    %172 = arith.divf %170, %171 : vector<16x1xf32>
    %173 = vector.broadcast %165 : vector<16x1xf32> to vector<16x32xf32>
    %174 = arith.subf %161, %173 : vector<16x32xf32>
    %cst_69 = arith.constant 9.99999974E-6 : f32
    %175 = vector.broadcast %cst_69 : f32 to vector<16x1xf32>
    %176 = arith.addf %172, %175 : vector<16x1xf32>
    %177 = math.rsqrt %176 : vector<16x1xf32>
    %178 = vector.broadcast %177 : vector<16x1xf32> to vector<16x32xf32>
    %179 = arith.mulf %174, %178 : vector<16x32xf32>
    %c0_70 = arith.constant 0 : index
    %c0_71 = arith.constant 0 : index
    %180 = vector.load %arg14[%c0_70, %c0_71] : memref<1x32xf32, #tpu.memory_space<vmem>>, vector<1x32xf32>
    %181 = vector.broadcast %180 : vector<1x32xf32> to vector<16x32xf32>
    %182 = arith.mulf %179, %181 : vector<16x32xf32>
    %c0_72 = arith.constant 0 : index
    %c0_73 = arith.constant 0 : index
    %183 = vector.load %arg15[%c0_72, %c0_73] : memref<1x32xf32, #tpu.memory_space<vmem>>, vector<1x32xf32>
    %184 = vector.broadcast %183 : vector<1x32xf32> to vector<16x32xf32>
    %185 = arith.addf %182, %184 : vector<16x32xf32>
    %c0_74 = arith.constant 0 : index
    %c0_75 = arith.constant 0 : index
    %186 = vector.load %arg16[%c0_74, %c0_75] : memref<16x32xf32, #tpu.memory_space<vmem>>, vector<16x32xf32>
    tpu.vector_store %arg16[%c0_74, %c0_75], %185 {strides = array<i32>} : memref<16x32xf32, #tpu.memory_space<vmem>>, vector<16x32xf32>,
    return
  }
  func.func @transform_0(%arg0: i32) -> (i32, i32) {
    %c0_i32 = arith.constant 0 : i32
    %c0_i32_0 = arith.constant 0 : i32
    %c0_i32_1 = arith.constant 0 : i32
    return %c0_i32, %c0_i32_0 : i32, i32
  }
  func.func @transform_1(%arg0: i32) -> (i32, i32) {
    %c0_i32 = arith.constant 0 : i32
    %c0_i32_0 = arith.constant 0 : i32
    %c0_i32_1 = arith.constant 0 : i32
    return %c0_i32, %c0_i32_0 : i32, i32
  }
  func.func @transform_2(%arg0: i32) -> (i32, i32) {
    %c0_i32 = arith.constant 0 : i32
    %c0_i32_0 = arith.constant 0 : i32
    %c0_i32_1 = arith.constant 0 : i32
    return %c0_i32, %c0_i32_0 : i32, i32
  }
  func.func @transform_3(%arg0: i32) -> (i32, i32) {
    %c0_i32 = arith.constant 0 : i32
    %c0_i32_0 = arith.constant 0 : i32
    %c0_i32_1 = arith.constant 0 : i32
    return %c0_i32, %c0_i32_0 : i32, i32
  }
  func.func @transform_4(%arg0: i32) -> (i32, i32) {
    %c0_i32 = arith.constant 0 : i32
    %c0_i32_0 = arith.constant 0 : i32
    %c0_i32_1 = arith.constant 0 : i32
    return %c0_i32, %c0_i32_0 : i32, i32
  }
  func.func @transform_5(%arg0: i32) -> (i32, i32, i32) {
    %c0_i32 = arith.constant 0 : i32
    %c0_i32_0 = arith.constant 0 : i32
    %c0_i32_1 = arith.constant 0 : i32
    %c0_i32_2 = arith.constant 0 : i32
    return %c0_i32, %c0_i32_0, %c0_i32_1 : i32, i32, i32
  }
  func.func @transform_6(%arg0: i32) -> (i32, i32) {
    %c0_i32 = arith.constant 0 : i32
    %c0_i32_0 = arith.constant 0 : i32
    %c0_i32_1 = arith.constant 0 : i32
    return %c0_i32, %c0_i32_0 : i32, i32
  }
  func.func @transform_7(%arg0: i32) -> (i32, i32) {
    %c0_i32 = arith.constant 0 : i32
    %c0_i32_0 = arith.constant 0 : i32
    %c0_i32_1 = arith.constant 0 : i32
    return %c0_i32, %c0_i32_0 : i32, i32
  }
  func.func @transform_8(%arg0: i32) -> (i32, i32) {
    %c0_i32 = arith.constant 0 : i32
    %c0_i32_0 = arith.constant 0 : i32
    %c0_i32_1 = arith.constant 0 : i32
    return %c0_i32, %c0_i32_0 : i32, i32
  }
  func.func @transform_9(%arg0: i32) -> (i32, i32) {
    %c0_i32 = arith.constant 0 : i32
    %c0_i32_0 = arith.constant 0 : i32
    %c0_i32_1 = arith.constant 0 : i32
    return %c0_i32, %c0_i32_0 : i32, i32
  }
  func.func @transform_10(%arg0: i32) -> (i32, i32) {
    %c0_i32 = arith.constant 0 : i32
    %c0_i32_0 = arith.constant 0 : i32
    %c0_i32_1 = arith.constant 0 : i32
    return %c0_i32, %c0_i32_0 : i32, i32
  }
  func.func @transform_11(%arg0: i32) -> (i32, i32) {
    %c0_i32 = arith.constant 0 : i32
    %c0_i32_0 = arith.constant 0 : i32
    %c0_i32_1 = arith.constant 0 : i32
    return %c0_i32, %c0_i32_0 : i32, i32
  }
  func.func @transform_12(%arg0: i32) -> (i32, i32) {
    %c0_i32 = arith.constant 0 : i32
    %c0_i32_0 = arith.constant 0 : i32
    %c0_i32_1 = arith.constant 0 : i32
    return %c0_i32, %c0_i32_0 : i32, i32
  }
  func.func @transform_13(%arg0: i32) -> (i32, i32) {
    %c0_i32 = arith.constant 0 : i32
    %c0_i32_0 = arith.constant 0 : i32
    %c0_i32_1 = arith.constant 0 : i32
    return %c0_i32, %c0_i32_0 : i32, i32
  }
  func.func @transform_14(%arg0: i32) -> (i32, i32) {
    %c0_i32 = arith.constant 0 : i32
    %c0_i32_0 = arith.constant 0 : i32
    %c0_i32_1 = arith.constant 0 : i32
    return %c0_i32, %c0_i32_0 : i32, i32
  }
  func.func @transform_15(%arg0: i32) -> (i32, i32) {
    %c0_i32 = arith.constant 0 : i32
    %c0_i32_0 = arith.constant 0 : i32
    %c0_i32_1 = arith.constant 0 : i32
    return %c0_i32, %c0_i32_0 : i32, i32
  }
}

</mosaic_0001>

<bundles_post_ra>
// kernel: tpu_custom_call.1
= control target key start
LH: loop header
LB: loop body
LE: loop exit
PB: predicated region body
PF: predicated region fallthrough
CT: control target
= control target key end

     0   :  { %20 = vsyncpa [#allocation3], 0  ;;  %s1349_s0 = inlined_call_operand.vmem [shape: f32[16,24], index: 0, kind: input, shape index: {}]   ;;  %s1350_s1 = inlined_call_operand.vmem [shape: f32[16,8], index: 1, kind: input, shape index: {}]   ;;  %s1351_s2 = inlined_call_operand.vmem [shape: f32[16,16], index: 2, kind: input, shape index: {}]   ;;  %s1352_s3 = inlined_call_operand.vmem [shape: bf16[32,96], index: 3, kind: input, shape index: {}]   ;;  %s1353_s4 = inlined_call_operand.hbm [shape: f32[1,96], index: 4, kind: input, shape index: {}]   ;;  %s1354_s5 = inlined_call_operand.hbm [shape: bf16[4,8,32], index: 5, kind: input, shape index: {}]   ;;  %s1355_s6 = inlined_call_operand.hbm [shape: f32[1,32], index: 6, kind: input, shape index: {}]   ;;  %s1356_s7 = inlined_call_operand.hbm [shape: f32[1,32], index: 7, kind: input, shape index: {}]   ;;  %s1357_s8 = inlined_call_operand.hbm [shape: f32[1,32], index: 8, kind: input, shape index: {}]   ;;  %s1358_s9 = inlined_call_operand.vmem [shape: bf16[32,64], index: 9, kind: input, shape index: {}]   ;;  %s1359_s10 = inlined_call_operand.vmem [shape: f32[1,64], index: 10, kind: input, shape index: {}]   ;;  %s1360_s11 = inlined_call_operand.vmem [shape: bf16[64,32], index: 11, kind: input, shape index: {}]   ;;  %s1361_s12 = inlined_call_operand.vmem [shape: f32[1,32], index: 12, kind: input, shape index: {}]   ;;  %s1362_s13 = inlined_call_operand.vmem [shape: f32[1,32], index: 13, kind: input, shape index: {}]   ;;  %s1363_s14 = inlined_call_operand.vmem [shape: f32[1,32], index: 14, kind: input, shape index: {}]   ;;  %s1364_s15 = inlined_call_operand.hbm [shape: f32[16,32], index: 15, kind: output, shape index: {}]  }
   0x1   :  { %21 = vsyncpa [#allocation6], 0 }
   0x2   :  { %22 = vsyncpa [#allocation9], 0  ;;  %s47_s20 = sshll.u32 %s1354_s5, 4  ;;  %s48_s20 = int_to_ptr.hbm [resolvable:$true] %s47_s20 }
   0x3   :  { %23 = vsyncpa [#allocation4], 0  ;;  %s1074_s21 = smov [#allocation5]   ;;  %s72_s25 = sshll.u32 %s1356_s7, 4  ;;  %s73_s25 = int_to_ptr.hbm [resolvable:$true] %s72_s25 }
   0x4   :  { %s49_s22 = sshll.u32 %s1074_s21, 4  ;;  %s1075_s26 = smov 64   ;;  %s50_s22 = int_to_ptr.vmem [resolvable:$true] %s49_s22 }
   0x5   :  { %s1076_s27 = smov 4   ;;  %s1077_s28 = smov [#allocation8]  }
   0x6   :  { %55 = dma.hbm_to_vmem [thread:$0]  %s48_s20, 256, %s50_s22, [#allocation6], %s1075_s26, %s1075_s26, %s1076_s27  }
   0x7   :  { %s74_s29 = sshll.u32 %s1077_s28, 4  ;;  %s37_s5 = sshll.u32 %s1353_s4, 4  ;;  %s75_s29 = int_to_ptr.vmem [resolvable:$true] %s74_s29  ;;  %s38_s5 = int_to_ptr.hbm [resolvable:$true] %s37_s5 }
   0x8   :  { %77 = dma.hbm_to_vmem [thread:$0]  %s73_s25, 16, %s75_s29, [#allocation9]  }
   0x9   :  { %s61_s19 = sshll.u32 %s1355_s6, 4  ;;  %s1078_s7 = smov [#allocation2]   ;;  %s62_s19 = int_to_ptr.hbm [resolvable:$true] %s61_s19 }
   0xa   :  { %s39_s21 = sshll.u32 %s1078_s7, 4  ;;  %s1079_s20 = smov [#allocation7]   ;;  %s40_s21 = int_to_ptr.vmem [resolvable:$true] %s39_s21 }
   0xb   :  { %42 = dma.hbm_to_vmem [thread:$0]  %s38_s5, 16, %s40_s21, [#allocation3]  }
   0xc   :  { %s63_s22 = sshll.u32 %s1079_s20, 4  ;;  %s83_s27 = sshll.u32 %s1357_s8, 4  ;;  %s64_s22 = int_to_ptr.vmem [resolvable:$true] %s63_s22  ;;  %s84_s27 = int_to_ptr.hbm [resolvable:$true] %s83_s27 }
   0xd   :  { %66 = dma.hbm_to_vmem [thread:$0]  %s62_s19, 16, %s64_s22, [#allocation6]  }
   0xe   :  { %s1080_s4 = smov [#allocation10]  }
   0xf   :  { %s85_s25 = sshll.u32 %s1080_s4, 4  ;;  %s86_s25 = int_to_ptr.vmem [resolvable:$true] %s85_s25 }
  0x10   :  { %88 = dma.hbm_to_vmem [thread:$0]  %s84_s27, 16, %s86_s25, [#allocation9]  }
  0x11   :  { %1066 = dma.done.wait [#allocation3], 16  }
  0x12   :  { %1067 = vsyncadd [#allocation3], 4294967280 }
  0x13   :  { %1068 = dma.done.wait [#allocation6], 272  }
  0x14   :  { %1069 = vsyncadd [#allocation6], 4294967024 }
  0x15   :  { %1070 = dma.done.wait [#allocation9], 32  }
  0x16   :  { %1071 = vsyncadd [#allocation9], 4294967264  ;;  %v124_v0 = vld [vmem:[%s1350_s1] sm:$0xff]  ;;  %s1081_s29 = smov 24   ;;  %v125_v1 = vld [vmem:[%s1350_s1 + $0x8] sm:$0xff]  ;;  %vm134_vm0 = vcmask 195584  }
  0x17   :  { %128 = vrot.lane.b32.xlu0 %v124_v0, %s1081_s29  ;;  %v843_v2 = vld [vmem:[%s1352_s3 + $0x8] sm:$0xff]  ;;  %v842_v3 = vld [vmem:[%s1352_s3] sm:$0xff]  ;;  %vm158_vm1 = vcmask 261120   ;;  %vm185_vm2 = vcmask 64512   ;;  %vm206_vm3 = vcmask 130048   ;;  %s1083_s24 = smov 80  }
  0x18   :  { %168 = vmatpush.bf16.msra.mxu0 %v843_v2  ;;  %v122_v5 = vld [vmem:[%s1349_s0] sm:$0xff]  ;;  %v123_v6 = vld [vmem:[%s1349_s0 + $0x8] sm:$0xff]  ;;  %s1082_s0 = smov 96   ;;  %s1085_s27 = smov 88   ;;  %vm326_vm4 = vcmask 1043456   ;;  %vm696_vm12 = vcmask 523264  }
  0x19   :  { %v872_v12 = vld [vmem:[#allocation2] ss:$0 sm:$0xff]  ;;  %v1233_v26 = vld [vmem:[%s1351_s2 + $0x8] sm:$0xff]  ;;  %s1086_s4 = smov 120   ;;  %s1087_s25 = smov 72  }
  0x1a   :  { %v1226_v22 = vld [vmem:[%s1351_s2] sm:$0xff]  ;;  %s1084_s2 = smov 112   ;;  %s1088_s6 = smov 104  }
  0x1b   :  { %v251_v40 = vld [vmem:[#allocation5] sm:$0xf]  ;;  %s1090_s28 = smov 48  }
  0x1c   :  { %169 = vmatpush.bf16.msra.mxu0 %v842_v3  ;;  %v348_v42 = vsel %vm326_vm4, %v251_v40, 0 }
  0x1f   :  { %130 = vrot.lane.b32.xlu0 %v125_v1, %s1081_s29  ;;  %s1091_s29 = smov 40  }
  0x89   :  { %v129_v4 = vpop.permute.xlu0 %128 }
  0x8a   :  { %v1211_v8 = vsel %vm134_vm0, %v122_v5, %v129_v4 }
  0x91   :  { %v131_v7 = vpop.permute.xlu0 %130 }
  0x92   :  { %v1213_v9 = vsel %vm134_vm0, %v123_v6, %v131_v7 }
  0x93   :  { %v137_v10 = vpack.c.bf16 %v1213_v9, %v1211_v8 }
  0x95   :  { %803 = vmatmul.msk.bf16.vlgmr.msra.gmra.mxu0 %vm158_vm1, %v137_v10 }
 0x112   :  { %v171_v11 = vpop.f32.mrf.mxu0 }
 0x113   :  { %v172_v13 = vadd.f32 %v872_v12, %v171_v11 }
 0x115   :  { %v178_v16 = vmul.f32 0.35355338, %v172_v13 }
 0x11a   :  { %v173_v14 = vpop.f32.mrf.mxu0 }
 0x11b   :  { %v174_v15 = vadd.f32 %v872_v12, %v173_v14 }
 0x11d   :  { %v179_v17 = vmul.f32 0.35355338, %v174_v15  ;;  %v1218_v18 = vpack.c.bf16 %v174_v15, %v172_v13 }
 0x11f   :  { %v180_v19 = vpack.c.bf16 %v179_v17, %v178_v16  ;;  %183 = vrot.lane.b32.xlu1 %v1218_v18, %s1082_s0 }
 0x191   :  { %v184_v20 = vpop.permute.xlu1 %183 }
 0x192   :  { %v190_v21 = vsel %vm185_vm2, %v184_v20, 0 }
 0x193   :  { %199 = vmatpush.bf16.xpose.msra.mxu1 %v190_v21 }
 0x19a   :  { %804 = vmatmul.msk.bf16.vlgmr.msra.gmra.mxu1 %vm185_vm2, %v180_v19 }
 0x19b   :  { %357 = vmatpush.bf16.msrb.mxu1 %v348_v42 }
 0x217   :  { %v201_v23 = vpop.f32.mrf.mxu1 }
 0x218   :  { %v202_v24 = vadd.f32 %v201_v23, %v1226_v22 }
 0x21a   :  { %v207_v25 = vsel %vm206_vm3, %v202_v24, -inf }
 0x21b   :  { %208 = vmax.xlane.f32.xlu1 %v207_v25 }
 0x21f   :  { %v203_v27 = vpop.f32.mrf.mxu1 }
 0x220   :  { %v204_v28 = vadd.f32 %v203_v27, %v1233_v26 }
 0x222   :  { %v210_v29 = vsel %vm206_vm3, %v204_v28, -inf }
 0x223   :  { %211 = vmax.xlane.f32.xlu2 %v210_v29 }
 0x234   :  { %366 = vrot.lane.b32.xlu1 %v1218_v18, %s1083_s24 }
 0x28e   :  { %v209_v30 = vpop.xlane.xlu1 %208 }
 0x28f   :  { %v213_v31 = vsub.f32 %v202_v24, %v209_v30 }
 0x291   :  { %v215_v32 = vmul.f32 1.442695, %v213_v31 }
 0x293   :  { %880 = vpow2.f32 %v215_v32 }
 0x296   :  { %v212_v33 = vpop.xlane.xlu2 %211 }
 0x297   :  { %v214_v34 = vsub.f32 %v204_v28, %v212_v33 }
 0x299   :  { %v881_v35 = vpop.eup %880  ;;  %v217_v36 = vmul.f32 1.442695, %v214_v34 }
 0x29a   :  { %v219_v37 = vsel %vm206_vm3, %v881_v35, 0.0 }
 0x29b   :  { %882 = vpow2.f32 %v217_v36  ;;  %220 = vadd.xlane.f32.xlu2 %v219_v37 }
 0x2a1   :  { %v883_v38 = vpop.eup %882 }
 0x2a2   :  { %v222_v39 = vsel %vm206_vm3, %v883_v38, 0.0 }
 0x2a3   :  { %223 = vadd.xlane.f32.xlu0 %v222_v39 }
 0x2a6   :  { %v367_v47 = vpop.permute.xlu1 %366 }
 0x2a7   :  { %v372_v52 = vsel %vm185_vm2, %v367_v47, 0 }
 0x2b3   :  { %230 = vrot.lane.b32.xlu2 %v1218_v18, %s1075_s26  ;;  %s1089_s26 = smov 56  }
 0x2b7   :  { %364 = vrot.lane.b32.xlu0 %v180_v19, %s1084_s2 }
 0x2bb   :  { %255 = vrot.lane.b32.xlu2 %v1218_v18, %s1085_s27 }
 0x2c3   :  { %253 = vrot.lane.b32.xlu2 %v180_v19, %s1086_s4 }
 0x2cb   :  { %458 = vrot.lane.b32.xlu2 %v1218_v18, %s1087_s25  ;;  %s780_s25 = sshll.u32 %s1364_s15, 4  ;;  %s781_s25 = int_to_ptr.hbm [resolvable:$true] %s780_s25 }
 0x2d3   :  { %456 = vrot.lane.b32.xlu2 %v180_v19, %s1088_s6  ;;  %s1095_s6 = smov 8  }
 0x30e   :  { %v221_v41 = vpop.xlane.xlu2 %220 }
 0x30f   :  { %884 = vrcp.f32 %v221_v41 }
 0x315   :  { %v885_v45 = vpop.eup %884 }
 0x316   :  { %v224_v43 = vpop.xlane.xlu0 %223  ;;  %v231_v44 = vpop.permute.xlu2 %230  ;;  %v227_v49 = vmul.f32 %v885_v45, %v881_v35 }
 0x317   :  { %886 = vrcp.f32 %v224_v43  ;;  %243 = vmatpush.bf16.msra.mxu2 %v231_v44 }
 0x31d   :  { %v887_v46 = vpop.eup %886 }
 0x31e   :  { %v256_v48 = vpop.permute.xlu2 %255  ;;  %v228_v50 = vmul.f32 %v887_v46, %v883_v38 }
 0x31f   :  { %v261_v51 = vsel %vm185_vm2, %v256_v48, 0 }
 0x320   :  { %270 = vmatpush.bf16.xpose.msra.mxu3 %v261_v51  ;;  %v229_v53 = vpack.c.bf16 %v228_v50, %v227_v49 }
 0x322   :  { %805 = vmatmul.msk.bf16.vlgmr.msra.gmra.mxu2 %vm206_vm3, %v229_v53 }
 0x326   :  { %v254_v54 = vpop.permute.xlu2 %253 }
 0x327   :  { %806 = vmatmul.msk.bf16.vlgmr.msra.gmra.mxu3 %vm185_vm2, %v254_v54 }
 0x328   :  { %381 = vmatpush.bf16.xpose.msrb.mxu3 %v372_v52 }
 0x329   :  { %v365_v57 = vpop.permute.xlu0 %364 }
 0x32e   :  { %v459_v55 = vpop.permute.xlu2 %458 }
 0x32f   :  { %v464_v56 = vsel %vm185_vm2, %v459_v55, 0 }
 0x330   :  { %473 = vmatpush.bf16.xpose.msra.mxu1 %v464_v56 }
 0x336   :  { %v457_v6 = vpop.permute.xlu2 %456 }
 0x337   :  { %810 = vmatmul.msk.bf16.vlgmr.msrb.gmra.mxu3 %vm185_vm2, %v365_v57 }
 0x3a5   :  { %v245_v58 = vpop.f32.mrf.mxu2 }
 0x3aa   :  { %v272_v59 = vpop.f32.mrf.mxu3 }
 0x3ab   :  { %v273_v60 = vadd.f32 %v272_v59, %v1226_v22 }
 0x3ad   :  { %v247_v61 = vpop.f32.mrf.mxu2  ;;  %v277_v62 = vsel %vm206_vm3, %v273_v60, -inf }
 0x3ae   :  { %v250_v63 = vpack.c.bf16 %v247_v61, %v245_v58  ;;  %278 = vmax.xlane.f32.xlu2 %v277_v62 }
 0x3b0   :  { %809 = vmatmul.msk.bf16.vlgmr.msrb.gmra.mxu1 %vm185_vm2, %v250_v63 }
 0x3b2   :  { %v274_v0 = vpop.f32.mrf.mxu3 }
 0x3b3   :  { %v275_v1 = vadd.f32 %v274_v0, %v1233_v26  ;;  %v322_v0 = vld [vmem:[#allocation5 + $0x4] sm:$0xf] }
 0x3b5   :  { %v280_v2 = vsel %vm206_vm3, %v275_v1, -inf }
 0x3b6   :  { %281 = vmax.xlane.f32.xlu1 %v280_v2 }
 0x3ba   :  { %v383_v3 = vpop.f32.mrf.mxu3 }
 0x3bb   :  { %v384_v4 = vadd.f32 %v383_v3, %v1226_v22 }
 0x3bd   :  { %v388_v5 = vsel %vm206_vm3, %v384_v4, -inf }
 0x3be   :  { %389 = vmax.xlane.f32.xlu1 %v388_v5 }
 0x3c0   :  { %813 = vmatmul.msk.bf16.vlgmr.msra.gmra.mxu1 %vm185_vm2, %v457_v6 }
 0x3c2   :  { %v385_v23 = vpop.f32.mrf.mxu3 }
 0x3c3   :  { %v386_v25 = vadd.f32 %v385_v23, %v1233_v26 }
 0x3c5   :  { %v391_v32 = vsel %vm206_vm3, %v386_v25, -inf }
 0x421   :  { %v279_v16 = vpop.xlane.xlu2 %278 }
 0x422   :  { %v283_v20 = vsub.f32 %v273_v60, %v279_v16 }
 0x424   :  { %v285_v24 = vmul.f32 1.442695, %v283_v20  ;;  %v525_v20 = vld [vmem:[#allocation5 + $0xc] sm:$0xf] }
 0x425   :  { %v530_v23 = vsel %vm326_vm4, %v525_v20, 0 }
 0x429   :  { %v282_v7 = vpop.xlane.xlu1 %281 }
 0x42a   :  { %v284_v10 = vsub.f32 %v275_v1, %v282_v7  ;;  %v328_v1 = vsel %vm326_vm4, %v322_v0, 0 }
 0x42b   :  { %337 = vmatpush.bf16.msrb.mxu0 %v328_v1 }
 0x42c   :  { %v287_v11 = vmul.f32 1.442695, %v284_v10 }
 0x42d   :  { %v1259_v12 = vpop.f32.mrf.mxu1 }
 0x42e   :  { %888 = vpow2.f32 %v287_v11 }
 0x42f   :  { %890 = vpow2.f32 %v285_v24 }
 0x431   :  { %v390_v27 = vpop.xlane.xlu1 %389 }
 0x432   :  { %v394_v30 = vsub.f32 %v384_v4, %v390_v27 }
 0x434   :  { %v889_v13 = vpop.eup %888 }
 0x435   :  { %v1261_v14 = vpop.f32.mrf.mxu1  ;;  %v292_v15 = vsel %vm206_vm3, %v889_v13, 0.0  ;;  %v891_v33 = vpop.eup %890 }
 0x436   :  { %293 = vadd.xlane.f32.xlu1 %v292_v15  ;;  %v289_v34 = vsel %vm206_vm3, %v891_v33, 0.0 }
 0x43d   :  { %v475_v17 = vpop.f32.mrf.mxu1 }
 0x43e   :  { %v476_v19 = vadd.f32 %v475_v17, %v1226_v22  ;;  %v396_v22 = vmul.f32 1.442695, %v394_v30 }
 0x440   :  { %v480_v21 = vsel %vm206_vm3, %v476_v19, -inf  ;;  %892 = vpow2.f32 %v396_v22 }
 0x441   :  { %481 = vmax.xlane.f32.xlu0 %v480_v21  ;;  %v433_v21 = vld [vmem:[#allocation5 + $0x8] sm:$0xf] }
 0x442   :  { %v438_v24 = vsel %vm326_vm4, %v433_v21, 0 }
 0x443   :  { %447 = vmatpush.bf16.msra.mxu0 %v438_v24 }
 0x445   :  { %v477_v28 = vpop.f32.mrf.mxu1 }
 0x446   :  { %v478_v29 = vadd.f32 %v477_v28, %v1233_v26  ;;  %v1271_v35 = vpop.eup %892 }
 0x447   :  { %v400_v36 = vsel %vm206_vm3, %v1271_v35, 0.0 }
 0x448   :  { %v483_v31 = vsel %vm206_vm3, %v478_v29, -inf }
 0x449   :  { %484 = vmax.xlane.f32.xlu2 %v483_v31  ;;  %392 = vmax.xlane.f32.xlu0 %v391_v32 }
 0x451   :  { %290 = vadd.xlane.f32.xlu2 %v289_v34 }
 0x459   :  { %401 = vadd.xlane.f32.xlu2 %v400_v36 }
 0x45d   :  { %300 = vrot.lane.b32.xlu0 %v1218_v18, %s1089_s26 }
 0x465   :  { %411 = vrot.lane.b32.xlu0 %v1218_v18, %s1090_s28 }
 0x4a9   :  { %v294_v46 = vpop.xlane.xlu1 %293 }
 0x4b4   :  { %v482_v26 = vpop.xlane.xlu0 %481 }
 0x4b5   :  { %v486_v37 = vsub.f32 %v476_v19, %v482_v26  ;;  %v873_v26 = vld [vmem:[#allocation7] ss:$0 sm:$0xff] }
 0x4b7   :  { %v488_v38 = vmul.f32 1.442695, %v486_v37 }
 0x4b9   :  { %894 = vpow2.f32 %v488_v38 }
 0x4bc   :  { %v485_v39 = vpop.xlane.xlu2 %484  ;;  %v393_v40 = vpop.xlane.xlu0 %392 }
 0x4bd   :  { %v487_v41 = vsub.f32 %v478_v29, %v485_v39  ;;  %v395_v44 = vsub.f32 %v386_v25, %v393_v40 }
 0x4bf   :  { %v895_v42 = vpop.eup %894  ;;  %v490_v43 = vmul.f32 1.442695, %v487_v41  ;;  %v398_v47 = vmul.f32 1.442695, %v395_v44 }
 0x4c0   :  { %v492_v45 = vsel %vm206_vm3, %v895_v42, 0.0 }
 0x4c1   :  { %896 = vpow2.f32 %v490_v43  ;;  %493 = vadd.xlane.f32.xlu2 %v492_v45 }
 0x4c4   :  { %v291_v48 = vpop.xlane.xlu2 %290 }
 0x4c5   :  { %898 = vrcp.f32 %v291_v48  ;;  %v1092_v48 = vmov 32.0  }
 0x4c6   :  { %900 = vrcp.f32 %v294_v46 }
 0x4c7   :  { %v897_v49 = vpop.eup %896  ;;  %902 = vpow2.f32 %v398_v47 }
 0x4c8   :  { %v495_v50 = vsel %vm206_vm3, %v897_v49, 0.0 }
 0x4c9   :  { %496 = vadd.xlane.f32.xlu1 %v495_v50 }
 0x4cb   :  { %v899_v51 = vpop.eup %898 }
 0x4cc   :  { %v901_v52 = vpop.eup %900  ;;  %v297_v54 = vmul.f32 %v899_v51, %v891_v33  ;;  %v402_v60 = vpop.xlane.xlu2 %401 }
 0x4cd   :  { %v903_v53 = vpop.eup %902  ;;  %v298_v55 = vmul.f32 %v901_v52, %v889_v13 }
 0x4ce   :  { %v403_v57 = vsel %vm206_vm3, %v903_v53, 0.0 }
 0x4cf   :  { %v301_v56 = vpop.permute.xlu0 %300  ;;  %v299_v58 = vpack.c.bf16 %v298_v55, %v297_v54 }
 0x4d0   :  { %313 = vmatpush.bf16.msrb.mxu2 %v301_v56 }
 0x4d1   :  { %404 = vadd.xlane.f32.xlu1 %v403_v57 }
 0x4d3   :  { %807 = vmatmul.msk.bf16.vlgmr.msrb.gmra.mxu2 %vm206_vm3, %v299_v58 }
 0x4d7   :  { %v412_v59 = vpop.permute.xlu0 %411 }
 0x4d8   :  { %424 = vmatpush.bf16.msra.mxu2 %v412_v59 }
 0x4d9   :  { %503 = vrot.lane.b32.xlu2 %v1218_v18, %s1091_s29 }
 0x4dc   :  { %539 = vmatpush.bf16.msrb.mxu2 %v530_v23  ;;  %v874_v23 = vld [vmem:[#allocation8] ss:$0 sm:$0xff] }
 0x534   :  { %v494_v61 = vpop.xlane.xlu2 %493 }
 0x535   :  { %904 = vrcp.f32 %v494_v61 }
 0x53b   :  { %v905_v2 = vpop.eup %904 }
 0x53c   :  { %v504_v62 = vpop.permute.xlu2 %503  ;;  %v497_v63 = vpop.xlane.xlu1 %496  ;;  %v500_v4 = vmul.f32 %v905_v2, %v895_v42  ;;  %v844_v2 = vld [vmem:[%s1358_s9] sm:$0xff] }
 0x53d   :  { %906 = vrcp.f32 %v497_v63  ;;  %516 = vmatpush.bf16.msra.mxu3 %v504_v62  ;;  %v845_v62 = vld [vmem:[%s1358_s9 + $0x8] sm:$0xff] }
 0x53e   :  { %908 = vrcp.f32 %v402_v60 }
 0x543   :  { %v907_v3 = vpop.eup %906 }
 0x544   :  { %v501_v5 = vmul.f32 %v907_v3, %v897_v49  ;;  %v405_v6 = vpop.xlane.xlu1 %404  ;;  %v909_v18 = vpop.eup %908 }
 0x545   :  { %910 = vrcp.f32 %v405_v6  ;;  %v408_v11 = vmul.f32 %v909_v18, %v1271_v35 }
 0x546   :  { %v502_v7 = vpack.c.bf16 %v501_v5, %v500_v4  ;;  %912 = vrcp.f32 %v1092_v48 }
 0x548   :  { %814 = vmatmul.msk.bf16.vlgmr.msra.gmra.mxu3 %vm206_vm3, %v502_v7 }
 0x54b   :  { %v911_v10 = vpop.eup %910 }
 0x54c   :  { %v409_v13 = vmul.f32 %v911_v10, %v903_v53  ;;  %v913_v49 = vpop.eup %912 }
 0x54d   :  { %v563_v50 = vmul.f32 32.0, %v913_v49  ;;  %vm567_vm5 = vweird.f32 %v913_v49 }
 0x54e   :  { %v410_v15 = vpack.c.bf16 %v409_v13, %v408_v11 }
 0x550   :  { %811 = vmatmul.msk.bf16.vlgmr.msra.gmra.mxu2 %vm206_vm3, %v410_v15 }
 0x556   :  { %v315_v16 = vpop.f32.mrf.mxu2 }
 0x55e   :  { %v317_v17 = vpop.f32.mrf.mxu2 }
 0x55f   :  { %v320_v19 = vpack.c.bf16 %v317_v17, %v315_v16 }
 0x561   :  { %808 = vmatmul.msk.bf16.vlgmr.msrb.gmra.mxu0 %vm185_vm2, %v320_v19 }
 0x562   :  { %649 = vmatpush.bf16.msrb.mxu0 %v845_v62 }
 0x566   :  { %650 = vmatpush.bf16.msrb.mxu0 %v844_v2 }
 0x5cb   :  { %v518_v25 = vpop.f32.mrf.mxu3 }
 0x5d3   :  { %v426_v27 = vpop.f32.mrf.mxu2  ;;  %v520_v28 = vpop.f32.mrf.mxu3 }
 0x5d4   :  { %v523_v29 = vpack.c.bf16 %v520_v28, %v518_v25  ;;  %v875_v28 = vld [vmem:[#allocation10] ss:$0 sm:$0xff] }
 0x5d6   :  { %815 = vmatmul.msk.bf16.vlgmr.msrb.gmra.mxu2 %vm185_vm2, %v523_v29 }
 0x5db   :  { %v428_v30 = vpop.f32.mrf.mxu2 }
 0x5dc   :  { %v431_v31 = vpack.c.bf16 %v428_v30, %v426_v27 }
 0x5de   :  { %812 = vmatmul.msk.bf16.vlgmr.msra.gmra.mxu0 %vm185_vm2, %v431_v31  ;;  %v339_v32 = vpop.f32.mrf.mxu0 }
 0x5df   :  { %v360_v33 = vadd.f32 %v1259_v12, %v339_v32 }
 0x5e6   :  { %v341_v22 = vpop.f32.mrf.mxu0 }
 0x5e7   :  { %v362_v39 = vadd.f32 %v1261_v14, %v341_v22  ;;  %v564_v14 = vsub.f32 1.0, %v563_v50 }
 0x5e9   :  { %v565_v51 = vmul.f32 %v913_v49, %v564_v14 }
 0x659   :  { %v541_v34 = vpop.f32.mrf.mxu2 }
 0x65b   :  { %v449_v35 = vpop.f32.mrf.mxu0 }
 0x65c   :  { %v454_v36 = vadd.f32 %v449_v35, %v360_v33  ;;  %v848_v35 = vld [vmem:[%s1360_s11 + $0x10] sm:$0xff] }
 0x65e   :  { %v546_v37 = vadd.f32 %v541_v34, %v454_v36  ;;  %v849_v34 = vld [vmem:[%s1360_s11 + $0x18] sm:$0xff]  ;;  %v847_v36 = vld [vmem:[%s1360_s11 + $0x8] sm:$0xff] }
 0x65f   :  { %704 = vmatpush.bf16.msrb.mxu1 %v849_v34 }
 0x660   :  { %v552_v38 = vadd.f32 %v873_v26, %v546_v37 }
 0x661   :  { %v543_v44 = vpop.f32.mrf.mxu2 }
 0x662   :  { %v554_v40 = vadd.f32 %v552_v38, %v1211_v8  ;;  %v566_v8 = vadd.f32 %v913_v49, %v565_v51  ;;  %v876_v38 = vld [vmem:[%s1359_s10] ss:$0 sm:$0xff] }
 0x663   :  { %v451_v41 = vpop.f32.mrf.mxu0  ;;  %705 = vmatpush.bf16.msrb.mxu1 %v848_v35 }
 0x664   :  { %v455_v42 = vadd.f32 %v451_v41, %v362_v39  ;;  %v556_v43 = vsel %vm158_vm1, %v554_v40, 0.0  ;;  %v1297_v52 = vsel %vm567_vm5, %v913_v49, %v566_v8 }
 0x665   :  { %557 = vadd.xlane.f32.xlu1 %v556_v43 }
 0x666   :  { %v547_v45 = vadd.f32 %v543_v44, %v455_v42 }
 0x667   :  { %706 = vmatpush.bf16.msrb.mxu1 %v847_v36 }
 0x668   :  { %v553_v46 = vadd.f32 %v873_v26, %v547_v45  ;;  %v846_v26 = vld [vmem:[%s1360_s11] sm:$0xff] }
 0x669   :  { %v877_v45 = vld [vmem:[%s1361_s12] ss:$0 sm:$0xff] }
 0x66a   :  { %v555_v12 = vadd.f32 %v553_v46, %v1213_v9 }
 0x66b   :  { %707 = vmatpush.bf16.msrb.mxu1 %v846_v26 }
 0x66c   :  { %v559_v47 = vsel %vm158_vm1, %v555_v12, 0.0 }
 0x66d   :  { %560 = vadd.xlane.f32.xlu0 %v559_v47 }
 0x6d8   :  { %v558_v53 = vpop.xlane.xlu1 %557 }
 0x6d9   :  { %v569_v54 = vmul.f32 %v1297_v52, %v558_v53 }
 0x6db   :  { %v571_v55 = vsub.f32 %v554_v40, %v569_v54 }
 0x6dd   :  { %v573_v56 = vmul.f32 %v571_v55, %v571_v55 }
 0x6df   :  { %v575_v9 = vsel %vm158_vm1, %v573_v56, 0.0 }
 0x6e0   :  { %576 = vadd.xlane.f32.xlu1 %v575_v9  ;;  %v561_v57 = vpop.xlane.xlu0 %560 }
 0x6e1   :  { %v570_v58 = vmul.f32 %v1297_v52, %v561_v57 }
 0x6e3   :  { %v572_v59 = vsub.f32 %v555_v12, %v570_v58 }
 0x6e5   :  { %v574_v60 = vmul.f32 %v572_v59, %v572_v59 }
 0x6e7   :  { %v578_v61 = vsel %vm158_vm1, %v574_v60, 0.0 }
 0x6e8   :  { %579 = vadd.xlane.f32.xlu1 %v578_v61 }
 0x753   :  { %v577_v63 = vpop.xlane.xlu1 %576 }
 0x754   :  { %v581_v0 = vmul.f32 %v577_v63, %v1297_v52 }
 0x756   :  { %v583_v1 = vadd.f32 1e-05, %v581_v0 }
 0x758   :  { %914 = vrsqrt.f32 %v583_v1  ;;  %vm591_vm7 = vweird.f32 %v583_v1 }
 0x75b   :  { %v580_v3 = vpop.xlane.xlu1 %579 }
 0x75c   :  { %v582_v4 = vmul.f32 %v580_v3, %v1297_v52 }
 0x75e   :  { %v915_v5 = vpop.eup %914  ;;  %v584_v6 = vadd.f32 1e-05, %v582_v4 }
 0x75f   :  { %v586_v7 = vmul.f32 %v915_v5, %v583_v1  ;;  %vm592_vm6 = vweird.f32 %v915_v5 }
 0x760   :  { %916 = vrsqrt.f32 %v584_v6  ;;  %vm593_vm8 = vmor %vm591_vm7, %vm592_vm6  ;;  %vm601_vm10 = vweird.f32 %v584_v6 }
 0x761   :  { %v587_v18 = vmul.f32 %v915_v5, %v586_v7 }
 0x763   :  { %v588_v10 = vmul.f32 0.5, %v587_v18 }
 0x765   :  { %v589_v11 = vsub.f32 1.5, %v588_v10 }
 0x766   :  { %v917_v13 = vpop.eup %916 }
 0x767   :  { %v590_v15 = vmul.f32 %v915_v5, %v589_v11  ;;  %v596_v16 = vmul.f32 %v917_v13, %v584_v6  ;;  %vm602_vm9 = vweird.f32 %v917_v13 }
 0x768   :  { %vm603_vm11 = vmor %vm601_vm10, %vm602_vm9 }
 0x769   :  { %v597_v17 = vmul.f32 %v917_v13, %v596_v16  ;;  %v594_v19 = vsel %vm593_vm8, %v915_v5, %v590_v15 }
 0x76a   :  { %v605_v24 = vmul.f32 %v594_v19, %v571_v55 }
 0x76b   :  { %v598_v20 = vmul.f32 0.5, %v597_v17 }
 0x76c   :  { %v611_v29 = vmul.f32 %v874_v23, %v605_v24 }
 0x76d   :  { %v599_v21 = vsub.f32 1.5, %v598_v20 }
 0x76e   :  { %v617_v32 = vadd.f32 %v875_v28, %v611_v29 }
 0x76f   :  { %v600_v25 = vmul.f32 %v917_v13, %v599_v21 }
 0x771   :  { %v604_v27 = vsel %vm603_vm11, %v917_v13, %v600_v25  ;;  %v878_v13 = vld [vmem:[%s1362_s13] ss:$0 sm:$0xff]  ;;  %s1093_s13 = smov [#allocation11]  }
 0x772   :  { %v606_v30 = vmul.f32 %v604_v27, %v572_v59  ;;  %s778_s2 = sshll.u32 %s1093_s13, 4  ;;  %s779_s2 = int_to_ptr.vmem [resolvable:$true] %s778_s2 }
 0x774   :  { %v612_v31 = vmul.f32 %v874_v23, %v606_v30 }
 0x776   :  { %v618_v22 = vadd.f32 %v875_v28, %v612_v31 }
 0x778   :  { %v619_v33 = vpack.c.bf16 %v618_v22, %v617_v32 }
 0x77a   :  { %824 = vmatmul.msk.bf16.vlgmr.msrb.gmra.mxu0 %vm158_vm1, %v619_v33 }
 0x7f7   :  { %v652_v37 = vpop.f32.mrf.mxu0 }
 0x7f8   :  { %v653_v39 = vadd.f32 %v876_v38, %v652_v37 }
 0x7fa   :  { %v657_v42 = vmax.f32 %v653_v39, 0.0 }
 0x7ff   :  { %v654_v40 = vpop.f32.mrf.mxu0 }
 0x800   :  { %v655_v41 = vadd.f32 %v876_v38, %v654_v40 }
 0x802   :  { %v658_v43 = vmax.f32 %v655_v41, 0.0 }
 0x804   :  { %v659_v44 = vpack.c.bf16 %v658_v43, %v657_v42 }
 0x806   :  { %841 = vmatmul.msk.bf16.vlgmr.msrb.gmra.mxu1 %vm696_vm12, %v659_v44 }
 0x883   :  { %v709_v46 = vpop.f32.mrf.mxu1 }
 0x884   :  { %v710_v12 = vadd.f32 %v877_v45, %v709_v46 }
 0x886   :  { %v714_v47 = vadd.f32 %v710_v12, %v617_v32 }
 0x888   :  { %v716_v48 = vsel %vm158_vm1, %v714_v47, 0.0 }
 0x889   :  { %717 = vadd.xlane.f32.xlu2 %v716_v48 }
 0x88b   :  { %v711_v49 = vpop.f32.mrf.mxu1 }
 0x88c   :  { %v712_v50 = vadd.f32 %v877_v45, %v711_v49 }
 0x88e   :  { %v715_v14 = vadd.f32 %v712_v50, %v618_v22 }
 0x890   :  { %v719_v51 = vsel %vm158_vm1, %v715_v14, 0.0 }
 0x891   :  { %720 = vadd.xlane.f32.xlu1 %v719_v51 }
 0x8fc   :  { %v718_v8 = vpop.xlane.xlu2 %717 }
 0x8fd   :  { %v722_v53 = vmul.f32 %v718_v8, %v1297_v52 }
 0x8ff   :  { %v724_v54 = vsub.f32 %v714_v47, %v722_v53 }
 0x901   :  { %v726_v55 = vmul.f32 %v724_v54, %v724_v54 }
 0x903   :  { %v728_v56 = vsel %vm158_vm1, %v726_v55, 0.0 }
 0x904   :  { %v721_v9 = vpop.xlane.xlu1 %720  ;;  %729 = vadd.xlane.f32.xlu1 %v728_v56 }
 0x905   :  { %v723_v57 = vmul.f32 %v721_v9, %v1297_v52 }
 0x907   :  { %v725_v58 = vsub.f32 %v715_v14, %v723_v57 }
 0x909   :  { %v727_v59 = vmul.f32 %v725_v58, %v725_v58 }
 0x90b   :  { %v731_v60 = vsel %vm158_vm1, %v727_v59, 0.0 }
 0x90c   :  { %732 = vadd.xlane.f32.xlu1 %v731_v60 }
 0x977   :  { %v730_v61 = vpop.xlane.xlu1 %729 }
 0x978   :  { %v734_v62 = vmul.f32 %v730_v61, %v1297_v52 }
 0x97a   :  { %v736_v63 = vadd.f32 1e-05, %v734_v62 }
 0x97c   :  { %918 = vrsqrt.f32 %v736_v63  ;;  %vm744_vm14 = vweird.f32 %v736_v63 }
 0x97f   :  { %v733_v0 = vpop.xlane.xlu1 %732 }
 0x980   :  { %v735_v1 = vmul.f32 %v733_v0, %v1297_v52  ;;  %v879_v52 = vld [vmem:[%s1363_s14] ss:$0 sm:$0xff]  ;;  %s1094_s14 = smov 128  }
 0x982   :  { %v919_v2 = vpop.eup %918  ;;  %v737_v3 = vadd.f32 1e-05, %v735_v1 }
 0x983   :  { %v739_v4 = vmul.f32 %v919_v2, %v736_v63  ;;  %vm745_vm13 = vweird.f32 %v919_v2 }
 0x984   :  { %920 = vrsqrt.f32 %v737_v3  ;;  %vm746_vm15 = vmor %vm744_vm14, %vm745_vm13  ;;  %vm754_vm2 = vweird.f32 %v737_v3 }
 0x985   :  { %v740_v5 = vmul.f32 %v919_v2, %v739_v4 }
 0x987   :  { %v741_v6 = vmul.f32 0.5, %v740_v5 }
 0x989   :  { %v742_v7 = vsub.f32 1.5, %v741_v6 }
 0x98a   :  { %v921_v18 = vpop.eup %920 }
 0x98b   :  { %v743_v10 = vmul.f32 %v919_v2, %v742_v7  ;;  %v749_v11 = vmul.f32 %v921_v18, %v737_v3  ;;  %vm755_vm0 = vweird.f32 %v921_v18 }
 0x98c   :  { %vm756_vm3 = vmor %vm754_vm2, %vm755_vm0 }
 0x98d   :  { %v747_v15 = vsel %vm746_vm15, %v919_v2, %v743_v10  ;;  %v750_v16 = vmul.f32 %v921_v18, %v749_v11 }
 0x98e   :  { %v758_v17 = vmul.f32 %v747_v15, %v724_v54 }
 0x98f   :  { %v751_v19 = vmul.f32 0.5, %v750_v16 }
 0x990   :  { %v764_v20 = vmul.f32 %v878_v13, %v758_v17 }
 0x991   :  { %v752_v21 = vsub.f32 1.5, %v751_v19 }
 0x992   :  { %v770_v23 = vadd.f32 %v879_v52, %v764_v20 }
 0x993   :  { %v753_v24 = vmul.f32 %v921_v18, %v752_v21 }
 0x994   :  { %772 = vst.msk [vmem:[#allocation11] sm:$0xff] %vm158_vm1, %v770_v23 }
 0x995   :  { %v757_v25 = vsel %vm756_vm3, %v921_v18, %v753_v24 }
 0x996   :  { %v759_v27 = vmul.f32 %v757_v25, %v725_v58 }
 0x998   :  { %v765_v28 = vmul.f32 %v878_v13, %v759_v27 }
 0x99a   :  { %v771_v29 = vadd.f32 %v879_v52, %v765_v28 }
 0x99c   :  { %773 = vst.msk [vmem:[#allocation11 + $0x8] sm:$0xff] %vm158_vm1, %v771_v29 }
 0x99d   :  { %786 = dma.vmem_to_hbm [thread:$0]  %s779_s2, 256, %s781_s25, [#allocation4], %s1094_s14, %s1094_s14, %s1095_s6  }
 0x99e   :  { %1072 = dma.done.wait [#allocation4], 256  }
 0x99f   :  { %1073 = vsyncadd [#allocation4], 4294967040 }
 0x9a0   :  { %791 = vsyncpa [#allocation3], 1 }
 0x9a1   :  { %792 = vsyncpa [#allocation6], 1 }
 0x9a2   :  { %793 = vsyncpa [#allocation9], 1 }
 0x9a3   :  { %794 = vsyncpa [#allocation4], 1 }

</bundles_post_ra>
